<compile_context>
chip_gen: v5e
topology: v5e:2x2
jax: 0.10.0
libtpu: 0.0.40
codegen_flags: <defaults>
</compile_context>

<pallas_src>
import functools

import jax
import jax.numpy as jnp
import numpy as np
from jax import lax
from jax.experimental import pallas as pl
from jax.experimental.pallas import tpu as pltpu

_LANE = 128
_SUB = 8


def _rn_loss_kernel(gt_ref, pred_ref, out_ref, first_ref, sum_ref, *, inv_n):
    p = pl.program_id(0)            # 0: find first-match index, 1: compute loss
    i = pl.program_id(1)            # tile index along the prediction (lane) axis
    nt = pl.num_programs(1)

    gt = gt_ref[...]                # (G, 8)   cols: y1 x1 y2 x2 label . . .
    pred = pred_ref[...]            # (8, TN)  rows: y1 x1 y2 x2 label score mask .
    G = gt.shape[0]
    TN = pred.shape[1]

    gt_y1 = gt[:, 0:1]
    gt_x1 = gt[:, 1:2]
    gt_y2 = gt[:, 2:3]
    gt_x2 = gt[:, 3:4]
    gt_lab = gt[:, 4:5]

    pr_y1 = pred[0:1, :]
    pr_x1 = pred[1:2, :]
    pr_y2 = pred[2:3, :]
    pr_x2 = pred[3:4, :]
    pr_lab = pred[4:5, :]

    # pairwise intersection (G, TN)
    tl_y = jnp.maximum(gt_y1, pr_y1)
    tl_x = jnp.maximum(gt_x1, pr_x1)
    br_y = jnp.minimum(gt_y2, pr_y2)
    br_x = jnp.minimum(gt_x2, pr_x2)
    valid = jnp.logical_and(tl_y < br_y, tl_x < br_x)
    area_i = jnp.where(valid, (br_y - tl_y) * (br_x - tl_x), 0.0)   # (G, TN)
    area_a = (gt_y2 - gt_y1) * (gt_x2 - gt_x1)                      # (G, 1)
    area_b = (pr_y2 - pr_y1) * (pr_x2 - pr_x1)                      # (1, TN)
    # iou > 0.5  <=>  2*area_i > area_a + area_b - area_i
    #            <=>  3*area_i > area_a + area_b        (division-free, NaN-free)
    match = jnp.logical_and(3.0 * area_i > area_a + area_b,
                            gt_lab == pr_lab)                       # (G, TN)

    big = nt * TN                                    # == padded N, > any index
    gidx = lax.broadcasted_iota(jnp.int32, (G, TN), 1) + i * TN
    sel = jnp.where(match, gidx, big)

    @pl.when(p == 0)
    def _():
        tile_min = jnp.min(sel, axis=1, keepdims=True)              # (G, 1)

        @pl.when(i == 0)
        def _():
            first_ref[...] = tile_min

        @pl.when(i > 0)
        def _():
            first_ref[...] = jnp.minimum(first_ref[...], tile_min)

    @pl.when(p == 1)
    def _():
        first = first_ref[...]                                      # (G, 1)
        # first == big (no match for that gt) never equals a real index, and
        # padded gt rows / padded lanes never match by construction.
        nms_gt = jnp.any(first == gidx, axis=0, keepdims=True)      # (1, TN)
        s = pred[5:6, :]
        vmask = pred[6:7, :]
        # nms_gt is exactly 0/1, so the two-term BCE collapses to one log.
        lv = jnp.log(jnp.where(nms_gt, s, 1.0 - s) + jnp.float32(1e-8))
        tile_sum = jnp.sum(lv * vmask)

        @pl.when(i == 0)
        def _():
            sum_ref[0] = tile_sum

        @pl.when(i > 0)
        def _():
            sum_ref[0] = sum_ref[0] + tile_sum

        @pl.when(i == nt - 1)
        def _():
            out_ref[0, 0] = -sum_ref[0] * inv_n


@functools.partial(jax.jit, static_argnames=("tn",))
def relation_networks_loss(gt_bboxes, gt_labels, nms_scores, sorted_labels,
                           sorted_cls_bboxes, *, tn=512):
    """gt_bboxes: (1, G, 4), gt_labels: (1, G), nms_scores: (N,),
       sorted_labels: (N,), sorted_cls_bboxes: (N, 4). Boxes are (y1,x1,y2,x2)."""
    # glue: stable descending sort of scores, reorder predictions accordingly.
    # TODO(synk): torch.sort(descending=True) is not guaranteed stable, so for
    # tied scores the chosen "first" match (and the loss) may differ from torch.
    order = jnp.argsort(-nms_scores)
    score = nms_scores[order].astype(jnp.float32)         # (N,)
    boxes = sorted_cls_bboxes[order].astype(jnp.float32)  # (N, 4)
    labels = sorted_labels[order].astype(jnp.float32)     # (N,) small ints exact in f32

    G = gt_bboxes.shape[1]
    N = nms_scores.shape[0]

    # pad G to a full sublane tile, N to a multiple of the lane-tile width
    g_pad = ((G + _SUB - 1) // _SUB) * _SUB
    n128 = ((N + _LANE - 1) // _LANE) * _LANE
    tn = max(_LANE, min((tn // _LANE) * _LANE, n128))
    n_pad = ((n128 + tn - 1) // tn) * tn
    nt = n_pad // tn

    # packed prediction slab (8, n_pad): rows 0-3 coords (coordinate-major so N
    # is the lane axis), row 4 label, row 5 score, row 6 validity mask.
    pred = jnp.zeros((8, n_pad), jnp.float32)
    pred = pred.at[4, :].set(-2.0)            # sentinel label: never matches
    pred = pred.at[5, :].set(0.5)             # harmless score for padded lanes
    pred = pred.at[0:4, :N].set(boxes.T)
    pred = pred.at[4, :N].set(labels)
    pred = pred.at[5, :N].set(score)
    pred = pred.at[6, :N].set(1.0)            # validity mask

    # packed gt slab (g_pad, 8): cols 0-3 coords, col 4 label.
    gt = jnp.zeros((g_pad, 8), jnp.float32)
    gt = gt.at[:, 4].set(-1.0)                # sentinel label for padded gt rows
    gt = gt.at[:G, 0:4].set(gt_bboxes[0].astype(jnp.float32))
    gt = gt.at[:G, 4].set(gt_labels[0].astype(jnp.float32))

    kernel = functools.partial(_rn_loss_kernel, inv_n=1.0 / N)
    out = pl.pallas_call(
        kernel,
        out_shape=jax.ShapeDtypeStruct((1, 1), jnp.float32),
        grid=(2, nt),
        in_specs=[
            pl.BlockSpec((g_pad, 8), lambda p, i: (0, 0)),   # gt slab, resident
            pl.BlockSpec((8, tn), lambda p, i: (0, i)),      # pred tiles, streamed
        ],
        out_specs=pl.BlockSpec((1, 1), lambda p, i: (0, 0),
                               memory_space=pltpu.MemorySpace.SMEM),
        scratch_shapes=[
            pltpu.VMEM((g_pad, 1), jnp.int32),     # per-gt first-match index
            pltpu.SMEM((1,), jnp.float32),         # running loss sum
        ],
        compiler_params=pltpu.CompilerParams(
            dimension_semantics=("arbitrary", "arbitrary")),
    )(gt, pred)
    return out[0, 0]


def _reference_loss(gt_bboxes, gt_labels, nms_scores, sorted_labels,
                    sorted_cls_bboxes):
    """Pure-numpy replica of the PyTorch forward for verification."""
    gt_bboxes = np.asarray(gt_bboxes, np.float32)
    gt_labels = np.asarray(gt_labels, np.int32)
    nms_scores = np.asarray(nms_scores, np.float32)
    sorted_labels = np.asarray(sorted_labels, np.int32)
    sorted_cls_bboxes = np.asarray(sorted_cls_bboxes, np.float32)

    order = np.argsort(-nms_scores, kind="stable")
    sorted_score = nms_scores[order]
    bb = sorted_cls_bboxes[order]
    lb = sorted_labels[order]

    a = gt_bboxes[0]
    tl = np.maximum(a[:, None, :2], bb[:, :2])
    br = np.minimum(a[:, None, 2:], bb[:, 2:])
    area_i = np.prod(br - tl, axis=2) * (tl < br).all(axis=2)
    area_a = np.prod(a[:, 2:] - a[:, :2], axis=1)
    area_b = np.prod(bb[:, 2:] - bb[:, :2], axis=1)
    iou = area_i / (area_a[:, None] + area_b - area_i)

    nms_gt = np.zeros_like(sorted_score)
    for g in range(len(iou)):
        accept_iou = np.reshape(np.argwhere(iou[g] > 0.5), -1)
        accept_label = np.reshape(
            np.argwhere(lb[accept_iou] == gt_labels[0][g]), -1)
        if len(accept_label) != 0:
            nms_gt[accept_iou[accept_label[0]]] = 1.0
    eps = 1e-8
    loss = nms_gt * np.log(sorted_score + eps) + \
        (1 - nms_gt) * np.log(1 - sorted_score + eps)
    return -loss.mean()


if __name__ == "__main__":
    key = jax.random.PRNGKey(0)
    # N deliberately not a multiple of 128: exercises padding/masking + grid.
    G, N, NUM_CLASSES = 6, 600, 5

    k1, k2, k3, k4, k5, k6 = jax.random.split(key, 6)

    # ground-truth boxes (1, G, 4) in (y1, x1, y2, x2)
    gt_yx = jax.random.uniform(k1, (G, 2), minval=0.0, maxval=60.0)
    gt_hw = jax.random.uniform(k2, (G, 2), minval=10.0, maxval=40.0)
    gt_bboxes = jnp.concatenate([gt_yx, gt_yx + gt_hw], axis=1)[None]      # (1, G, 4)
    gt_labels = jax.random.randint(k3, (1, G), 0, NUM_CLASSES)             # (1, G)

    # predicted boxes: perturbations of gt boxes tiled over N, plus noise
    base = jnp.tile(gt_bboxes[0], (N // G, 1))                              # (N, 4)
    noise = jax.random.uniform(k4, (N, 4), minval=-4.0, maxval=4.0)
    sorted_cls_bboxes = base + noise                                        # (N, 4)
    sorted_labels = jax.random.randint(k5, (N,), 0, NUM_CLASSES)            # (N,)
    nms_scores = jax.random.uniform(k6, (N,), minval=0.01, maxval=0.99)     # (N,)

    loss = relation_networks_loss(gt_bboxes, gt_labels, nms_scores,
                                  sorted_labels, sorted_cls_bboxes, tn=256)
    loss = jax.block_until_ready(loss)

    ref = _reference_loss(gt_bboxes, gt_labels, nms_scores,
                          sorted_labels, sorted_cls_bboxes)
    assert np.allclose(np.asarray(loss), ref, rtol=1e-5, atol=1e-5), (loss, ref)
    print("KERNEL_OK")
</pallas_src>

<mosaic_0001>
module attributes {stable_mosaic.version = 11 : i64} {
  func.func @_rn_loss_kernel(%arg0: i32, %arg1: i32, %arg2: memref<8x8xf32, #tpu.memory_space<vmem>>, %arg3: memref<8x256xf32, #tpu.memory_space<vmem>>, %arg4: memref<1x1xf32, #tpu.memory_space<smem>>, %arg5: memref<8x1xi32, #tpu.memory_space<vmem>>, %arg6: memref<1xf32, #tpu.memory_space<smem>>) attributes {dimension_semantics = [#tpu.dimension_semantics<arbitrary>, #tpu.dimension_semantics<arbitrary>], iteration_bounds = array<i64: 2, 3>, scalar_prefetch = 0 : i64, scratch_operands = 2 : i64, tpu.core_type = #tpu.core_type<tc>, window_params = [{pipeline_mode = #tpu.pipeline_mode<synchronous>, transform_indices = @transform_0, window_bounds = array<i64: 8, 8>}, {transform_indices = @transform_1, window_bounds = array<i64: 8, 256>}, {transform_indices = @transform_2, window_bounds = array<i64: 1, 1>}]} {
    %c0 = arith.constant 0 : index
    %c0_0 = arith.constant 0 : index
    %0 = vector.load %arg2[%c0, %c0_0] : memref<8x8xf32, #tpu.memory_space<vmem>>, vector<8x8xf32>
    %c0_1 = arith.constant 0 : index
    %c0_2 = arith.constant 0 : index
    %1 = vector.load %arg3[%c0_1, %c0_2] : memref<8x256xf32, #tpu.memory_space<vmem>>, vector<8x256xf32>
    %2 = vector.extract_strided_slice %0 {offsets = [0, 0], sizes = [8, 1], strides = [1, 1]} : vector<8x8xf32> to vector<8x1xf32>
    %3 = vector.extract_strided_slice %0 {offsets = [0, 1], sizes = [8, 1], strides = [1, 1]} : vector<8x8xf32> to vector<8x1xf32>
    %4 = vector.extract_strided_slice %0 {offsets = [0, 2], sizes = [8, 1], strides = [1, 1]} : vector<8x8xf32> to vector<8x1xf32>
    %5 = vector.extract_strided_slice %0 {offsets = [0, 3], sizes = [8, 1], strides = [1, 1]} : vector<8x8xf32> to vector<8x1xf32>
    %6 = vector.extract_strided_slice %0 {offsets = [0, 4], sizes = [8, 1], strides = [1, 1]} : vector<8x8xf32> to vector<8x1xf32>
    %7 = vector.extract_strided_slice %1 {offsets = [0, 0], sizes = [1, 256], strides = [1, 1]} : vector<8x256xf32> to vector<1x256xf32>
    %8 = vector.extract_strided_slice %1 {offsets = [1, 0], sizes = [1, 256], strides = [1, 1]} : vector<8x256xf32> to vector<1x256xf32>
    %9 = vector.extract_strided_slice %1 {offsets = [2, 0], sizes = [1, 256], strides = [1, 1]} : vector<8x256xf32> to vector<1x256xf32>
    %10 = vector.extract_strided_slice %1 {offsets = [3, 0], sizes = [1, 256], strides = [1, 1]} : vector<8x256xf32> to vector<1x256xf32>
    %11 = vector.extract_strided_slice %1 {offsets = [4, 0], sizes = [1, 256], strides = [1, 1]} : vector<8x256xf32> to vector<1x256xf32>
    %12 = vector.broadcast %2 : vector<8x1xf32> to vector<8x256xf32>
    %13 = vector.broadcast %7 : vector<1x256xf32> to vector<8x256xf32>
    %14 = arith.maximumf %12, %13 : vector<8x256xf32>
    %15 = vector.broadcast %3 : vector<8x1xf32> to vector<8x256xf32>
    %16 = vector.broadcast %8 : vector<1x256xf32> to vector<8x256xf32>
    %17 = arith.maximumf %15, %16 : vector<8x256xf32>
    %18 = vector.broadcast %4 : vector<8x1xf32> to vector<8x256xf32>
    %19 = vector.broadcast %9 : vector<1x256xf32> to vector<8x256xf32>
    %20 = arith.minimumf %18, %19 : vector<8x256xf32>
    %21 = vector.broadcast %5 : vector<8x1xf32> to vector<8x256xf32>
    %22 = vector.broadcast %10 : vector<1x256xf32> to vector<8x256xf32>
    %23 = arith.minimumf %21, %22 : vector<8x256xf32>
    %24 = arith.cmpf olt, %14, %20 : vector<8x256xf32>
    %25 = arith.cmpf olt, %17, %23 : vector<8x256xf32>
    %26 = arith.andi %24, %25 : vector<8x256xi1>
    %27 = arith.subf %20, %14 : vector<8x256xf32>
    %28 = arith.subf %23, %17 : vector<8x256xf32>
    %29 = arith.mulf %27, %28 : vector<8x256xf32>
    %cst = arith.constant 0.000000e+00 : f32
    %30 = vector.broadcast %cst : f32 to vector<8x256xf32>
    %31 = arith.select %26, %29, %30 : vector<8x256xi1>, vector<8x256xf32>
    %32 = arith.subf %4, %2 : vector<8x1xf32>
    %33 = arith.subf %5, %3 : vector<8x1xf32>
    %34 = arith.mulf %32, %33 : vector<8x1xf32>
    %35 = arith.subf %9, %7 : vector<1x256xf32>
    %36 = arith.subf %10, %8 : vector<1x256xf32>
    %37 = arith.mulf %35, %36 : vector<1x256xf32>
    %cst_3 = arith.constant 3.000000e+00 : f32
    %38 = vector.broadcast %cst_3 : f32 to vector<8x256xf32>
    %39 = arith.mulf %38, %31 : vector<8x256xf32>
    %40 = vector.broadcast %34 : vector<8x1xf32> to vector<8x256xf32>
    %41 = vector.broadcast %37 : vector<1x256xf32> to vector<8x256xf32>
    %42 = arith.addf %40, %41 : vector<8x256xf32>
    %43 = arith.cmpf ogt, %39, %42 : vector<8x256xf32>
    %44 = vector.broadcast %6 : vector<8x1xf32> to vector<8x256xf32>
    %45 = vector.broadcast %11 : vector<1x256xf32> to vector<8x256xf32>
    %46 = arith.cmpf oeq, %44, %45 : vector<8x256xf32>
    %47 = arith.andi %43, %46 : vector<8x256xi1>
    %48 = tpu.iota {dimensions = array<i32: 1>} : vector<8x256xi32>
    %c256_i32 = arith.constant 256 : i32
    %49 = arith.muli %arg1, %c256_i32 : i32
    %50 = vector.broadcast %49 : i32 to vector<8x256xi32>
    %51 = arith.addi %48, %50 : vector<8x256xi32>
    %c768_i32 = arith.constant 768 : i32
    %52 = vector.broadcast %c768_i32 : i32 to vector<8x256xi32>
    %53 = arith.select %47, %51, %52 : vector<8x256xi1>, vector<8x256xi32>
    %c0_i32 = arith.constant 0 : i32
    %54 = arith.cmpi eq, %arg0, %c0_i32 : i32
    %55 = arith.extui %54 : i1 to i32
    %c0_i32_4 = arith.constant 0 : i32
    %56 = arith.cmpi ne, %55, %c0_i32_4 : i32
    scf.if %56 {
      %cst_6 = arith.constant dense<2147483647> : vector<8xi32>
      %60 = vector.multi_reduction <minsi>, %53, %cst_6 [1] : vector<8x256xi32> to vector<8xi32>
      %61 = vector.shape_cast %60 : vector<8xi32> to vector<8x1xi32>
      %c0_i32_7 = arith.constant 0 : i32
      %62 = arith.cmpi eq, %arg1, %c0_i32_7 : i32
      %63 = arith.extui %62 : i1 to i32
      %c0_i32_8 = arith.constant 0 : i32
      %64 = arith.cmpi ne, %63, %c0_i32_8 : i32
      scf.if %64 {
        %c0_11 = arith.constant 0 : index
        %c0_12 = arith.constant 0 : index
        %68 = vector.load %arg5[%c0_11, %c0_12] : memref<8x1xi32, #tpu.memory_space<vmem>>, vector<8x1xi32>
        tpu.vector_store %arg5[%c0_11, %c0_12], %61 {strides = array<i32>} : memref<8x1xi32, #tpu.memory_space<vmem>>, vector<8x1xi32>,
      } else {
      }
      %c0_i32_9 = arith.constant 0 : i32
      %65 = arith.cmpi sgt, %arg1, %c0_i32_9 : i32
      %66 = arith.extui %65 : i1 to i32
      %c0_i32_10 = arith.constant 0 : i32
      %67 = arith.cmpi ne, %66, %c0_i32_10 : i32
      scf.if %67 {
        %c0_11 = arith.constant 0 : index
        %c0_12 = arith.constant 0 : index
        %68 = vector.load %arg5[%c0_11, %c0_12] : memref<8x1xi32, #tpu.memory_space<vmem>>, vector<8x1xi32>
        %69 = arith.minsi %68, %61 : vector<8x1xi32>
        %c0_13 = arith.constant 0 : index
        %c0_14 = arith.constant 0 : index
        %70 = vector.load %arg5[%c0_13, %c0_14] : memref<8x1xi32, #tpu.memory_space<vmem>>, vector<8x1xi32>
        tpu.vector_store %arg5[%c0_13, %c0_14], %69 {strides = array<i32>} : memref<8x1xi32, #tpu.memory_space<vmem>>, vector<8x1xi32>,
      } else {
      }
    } else {
    }
    %c1_i32 = arith.constant 1 : i32
    %57 = arith.cmpi eq, %arg0, %c1_i32 : i32
    %58 = arith.extui %57 : i1 to i32
    %c0_i32_5 = arith.constant 0 : i32
    %59 = arith.cmpi ne, %58, %c0_i32_5 : i32
    scf.if %59 {
      %c0_6 = arith.constant 0 : index
      %c0_7 = arith.constant 0 : index
      %60 = vector.load %arg5[%c0_6, %c0_7] : memref<8x1xi32, #tpu.memory_space<vmem>>, vector<8x1xi32>
      %61 = vector.broadcast %60 : vector<8x1xi32> to vector<8x256xi32>
      %62 = arith.cmpi eq, %61, %51 : vector<8x256xi32>
      %cst_8 = arith.constant 1.000000e+00 : f32
      %cst_9 = arith.constant 0.000000e+00 : f32
      %63 = vector.broadcast %cst_8 : f32 to vector<8x256xf32>
      %64 = vector.broadcast %cst_9 : f32 to vector<8x256xf32>
      %65 = arith.select %62, %63, %64 : vector<8x256xi1>, vector<8x256xf32>
      %cst_10 = arith.constant dense<0xFF800000> : vector<256xf32>
      %66 = vector.multi_reduction <maximumf>, %65, %cst_10 [0] : vector<8x256xf32> to vector<256xf32>
      %cst_11 = arith.constant 0.000000e+00 : f32
      %67 = vector.broadcast %cst_11 : f32 to vector<256xf32>
      %68 = arith.cmpf ogt, %66, %67 : vector<256xf32>
      %69 = vector.shape_cast %68 : vector<256xi1> to vector<1x256xi1>
      %70 = vector.extract_strided_slice %1 {offsets = [5, 0], sizes = [1, 256], strides = [1, 1]} : vector<8x256xf32> to vector<1x256xf32>
      %71 = vector.extract_strided_slice %1 {offsets = [6, 0], sizes = [1, 256], strides = [1, 1]} : vector<8x256xf32> to vector<1x256xf32>
      %cst_12 = arith.constant 1.000000e+00 : f32
      %72 = vector.broadcast %cst_12 : f32 to vector<1x256xf32>
      %73 = arith.subf %72, %70 : vector<1x256xf32>
      %74 = arith.select %69, %70, %73 : vector<1x256xi1>, vector<1x256xf32>
      %cst_13 = arith.constant 9.99999993E-9 : f32
      %75 = vector.broadcast %cst_13 : f32 to vector<1x256xf32>
      %76 = arith.addf %74, %75 : vector<1x256xf32>
      %77 = math.log %76 : vector<1x256xf32>
      %78 = arith.mulf %77, %71 : vector<1x256xf32>
      %79 = vector.shape_cast %78 : vector<1x256xf32> to vector<1x1x256xf32>
      %cst_14 = arith.constant dense<0.000000e+00> : vector<1xf32>
      %80 = vector.multi_reduction <add>, %79, %cst_14 [1, 2] : vector<1x1x256xf32> to vector<1xf32>
      %81 = vector.shape_cast %80 : vector<1xf32> to vector<1x1x1xf32>
      %82 = vector.extract %81[0, 0, 0] : f32 from vector<1x1x1xf32>
      %c0_i32_15 = arith.constant 0 : i32
      %83 = arith.cmpi eq, %arg1, %c0_i32_15 : i32
      %84 = arith.extui %83 : i1 to i32
      %c0_i32_16 = arith.constant 0 : i32
      %85 = arith.cmpi ne, %84, %c0_i32_16 : i32
      scf.if %85 {
        %c0_20 = arith.constant 0 : index
        %92 = memref.load %arg6[%c0_20] : memref<1xf32, #tpu.memory_space<smem>>
        memref.store %82, %arg6[%c0_20] : memref<1xf32, #tpu.memory_space<smem>>
      } else {
      }
      %c0_i32_17 = arith.constant 0 : i32
      %86 = arith.cmpi sgt, %arg1, %c0_i32_17 : i32
      %87 = arith.extui %86 : i1 to i32
      %c0_i32_18 = arith.constant 0 : i32
      %88 = arith.cmpi ne, %87, %c0_i32_18 : i32
      scf.if %88 {
        %c0_20 = arith.constant 0 : index
        %92 = memref.load %arg6[%c0_20] : memref<1xf32, #tpu.memory_space<smem>>
        %93 = arith.addf %92, %82 : f32
        %c0_21 = arith.constant 0 : index
        %94 = memref.load %arg6[%c0_21] : memref<1xf32, #tpu.memory_space<smem>>
        memref.store %93, %arg6[%c0_21] : memref<1xf32, #tpu.memory_space<smem>>
      } else {
      }
      %c2_i32 = arith.constant 2 : i32
      %89 = arith.cmpi eq, %arg1, %c2_i32 : i32
      %90 = arith.extui %89 : i1 to i32
      %c0_i32_19 = arith.constant 0 : i32
      %91 = arith.cmpi ne, %90, %c0_i32_19 : i32
      scf.if %91 {
        %c0_20 = arith.constant 0 : index
        %92 = memref.load %arg6[%c0_20] : memref<1xf32, #tpu.memory_space<smem>>
        %cst_21 = arith.constant 0.000000e+00 : f32
        %93 = arith.subf %cst_21, %92 : f32
        %cst_22 = arith.constant 0.00166666671 : f32
        %94 = arith.mulf %93, %cst_22 : f32
        %c0_23 = arith.constant 0 : index
        %c0_24 = arith.constant 0 : index
        %95 = memref.load %arg4[%c0_23, %c0_24] : memref<1x1xf32, #tpu.memory_space<smem>>
        memref.store %94, %arg4[%c0_23, %c0_24] : memref<1x1xf32, #tpu.memory_space<smem>>
      } else {
      }
    } else {
    }
    return
  }
  func.func @transform_0(%arg0: i32, %arg1: i32) -> (i32, i32) {
    %c0_i32 = arith.constant 0 : i32
    %c0_i32_0 = arith.constant 0 : i32
    %c0_i32_1 = arith.constant 0 : i32
    return %c0_i32, %c0_i32_0 : i32, i32
  }
  func.func @transform_1(%arg0: i32, %arg1: i32) -> (i32, i32) {
    %c0_i32 = arith.constant 0 : i32
    %c0_i32_0 = arith.constant 0 : i32
    return %c0_i32, %arg1 : i32, i32
  }
  func.func @transform_2(%arg0: i32, %arg1: i32) -> (i32, i32) {
    %c0_i32 = arith.constant 0 : i32
    %c0_i32_0 = arith.constant 0 : i32
    %c0_i32_1 = arith.constant 0 : i32
    return %c0_i32, %c0_i32_0 : i32, i32
  }
}

</mosaic_0001>

<bundles_post_ra>
// kernel: neg.1
= control target key start
LH: loop header
LB: loop body
LE: loop exit
PB: predicated region body
PF: predicated region fallthrough
CT: control target
= control target key end

     0   :  { %s24_s0 = inlined_call_operand.vmem [shape: f32[600], index: 0, kind: input, shape index: {}]   ;;  %s25_s1 = inlined_call_operand.vmem [shape: f32[600], index: 1, kind: output, shape index: {}]  }
   0x1   :  { %v2_v0 = vld [vmem:[%s24_s0] sm:$0x1f] }
   0x2   :  { %v5_v1 = vxor.u32 2147483648, %v2_v0 }
   0x4   :  { %7 = vst [vmem:[%s25_s1] sm:$0xff] %v5_v1 }

// kernel: relation_networks_loss.1
= control target key start
LH: loop header
LB: loop body
LE: loop exit
PB: predicated region body
PF: predicated region fallthrough
CT: control target
= control target key end

     0   :  { %7 = vsyncpa [#allocation5], 0  ;;  %s609_s9 = smov 0   ;;  %s611_s10 = smov 0   ;;  %s709_s0 = inlined_call_operand.vmem [shape: f32[8,8], index: 0, kind: input, shape index: {}]   ;;  %s710_s1 = inlined_call_operand.vmem [shape: f32[8,768], index: 1, kind: input, shape index: {}]   ;;  %s711_s2 = inlined_call_operand.hbm [shape: f32[1,1], index: 2, kind: output, shape index: {}]  }
   0x1   :  { %s613_s11 = smov 0   ;;  %s615_s12 = smov 0  }
   0x2   :  { %s617_s13 = smov 0  }
   0x3 LB: > { %s429_s14 = sadd.s32 4294967295, %s582_s13   ;;  %s22_s15 = sadd.s32 1, %s574_s11  ;;  %s582_s13 = sphi %s617_s13, %s13_s13   ;;  %s578_s12 = sphi %s615_s12, %s717_s12   ;;  %s574_s11 = sphi %s613_s11, %s716_s11   ;;  %s570_s10 = sphi %s611_s10, %s715_s10   ;;  %s566_s9 = sphi %s609_s9, %s714_s9  }
   0x4   : > { %p23_p0 = scmp.ge.s32.totalorder %s22_s15, 3  ;;  %s25_s16 = sadd.s32 1, %s578_s12 }
   0x5   : > { %p432_p1 = scmp.ge.s32.totalorder %s582_s13, 1  ;;  %p121_p2 = scmp.lt.s32.totalorder %s582_s13, 7 }
   0x6   : > { %s719_s15 = smov (%p23_p0, %s22_s15), 0  ;;  %s721_s16 = smov (!%p23_p0, %s25_s16), %s578_s12 }
   0x7   : > { %p122_p3 = pnand %p432_p1, %p121_p2  ;;  %p27_p4 = scmp.ge.s32.totalorder %s721_s16, 2 }
   0x8   : > { %s584_s19 = smov (!%p122_p3), 2   ;;  %s588_s20 = smov (!%p122_p3), 127  }
   0x9   : > { %s723_s16 = smov (%p27_p4, %s721_s16), 0  ;;  %125 = sbr.rel (%p122_p3) target bundleno = 990 (0x3de), region = 28 }
   0xa   : > { %s433_s21 = sshll.u32 (!%p122_p3), %s566_s9, 1  ;;  %s435_s26 = sshll.u32 (!%p122_p3), %s566_s9, 8 }
   0xb   : > { %p139_p5 = scmp.lt.s32.totalorder (!%p122_p3), %s433_s21, 5  ;;  %p436_p6 = scmp.ne.s32.totalorder (!%p122_p3), %s570_s10, 0 }
   0xe   : > { %v144_v0 = vld [vmem:[%s709_s0] sm:$0xff]  ;;  %v585_v1 = vmov 0   ;;  %v586_v2 = vmov 2   ;;  %v587_v3 = vmov 1   ;;  %v589_v6 = vmov 4   ;;  %s725_s21 = smov (!%p139_p5, %s433_s21), 5 }
   0xf   : > { %194 = vrot.lane.b32.xlu0 %v144_v0, %s584_s19  ;;  %514 = vset.pattern.permute.xlu1 %v585_v1  ;;  %v590_v7 = vmov 3   ;;  %s434_s22 = sshll.u32 %s725_s21, 3  ;;  %v242_v42 = vlaneseq  ;;  %v246_v55 = vstv %s435_s26  ;;  %p437_p7 = scmp.ne.s32.totalorder (!%p436_p6), %s566_s9, 0 }
  0x10   : > { %516 = vset.pattern.permute.xlu2 %v586_v2  ;;  %149 = vperm.xlu1 %514, %v144_v0   ;;  %s142_s25 = scalar_lea.vmem %s710_s1, %s434_s22 }
  0x11   : > { %165 = vperm.xlu2 %516, %v144_v0   ;;  %518 = vset.pattern.permute.xlu0 %v586_v2  ;;  %v651_v12 = vld [vmem:[%s142_s25] sm:$0xff]  ;;  %v653_v13 = vld [vmem:[%s142_s25 + $0x8] sm:$0xff]  ;;  %v243_v48 = vand.u32 127, %v242_v42 }
  0x12   : > { %v168_v14 = vperm.slane %v651_v12, 2  ;;  %v169_v15 = vperm.slane %v653_v13, 2  ;;  %v152_v16 = vperm.slane %v651_v12, 0  ;;  %v153_v17 = vperm.slane %v653_v13, 0 }
  0x13   : > { %v176_v18 = vperm.slane %v651_v12, 3  ;;  %v160_v19 = vperm.slane %v651_v12, 1  ;;  %v177_v21 = vperm.slane %v653_v13, 3  ;;  %v161_v23 = vperm.slane %v653_v13, 1 }
  0x14   : > { %v205_v24 = vrot.slane %v651_v12, 6  ;;  %v206_v25 = vrot.slane %v653_v13, 6  ;;  %v236_v53 = vperm.slane %v651_v12, 4  ;;  %v244_v54 = vadd.s32 128, %v243_v48 }
  0x15   : > { %v237_v57 = vperm.slane %v653_v13, 4  ;;  %v247_v63 = vadd.s32 %v246_v55, %v243_v48 }
  0x16   : > { %v209_v34 = vsub.f32 %v651_v12, %v205_v24  ;;  %v210_v35 = vsub.f32 %v653_v13, %v206_v25 }
  0x18   : > { %515 = vset.pattern.permute.xlu1 %v587_v3  ;;  %v213_v40 = vrot.slane %v209_v34, 1  ;;  %v214_v41 = vrot.slane %v210_v35, 1 }
  0x19   : > { %157 = vperm.xlu1 %515, %v144_v0   ;;  %517 = vset.pattern.permute.xlu2 %v590_v7 }
  0x1a   : > { %173 = vperm.xlu2 %517, %v144_v0   ;;  %v217_v46 = vmul.f32 %v213_v40, %v209_v34  ;;  %v218_v47 = vmul.f32 %v214_v41, %v210_v35 }
  0x1c   : > { %v226_v50 = vperm.slane %v217_v46, 2  ;;  %v227_v51 = vperm.slane %v218_v47, 2 }
  0x21   : > { %519 = vset.pattern.permute.xlu1 %v589_v6 }
  0x22   : > { %233 = vperm.xlu1 %519, %v144_v0  }
  0x6b   : > { %v166_v10 = vpop.permute.xlu2 %165 }
  0x6c   : > { %v170_v26 = vmin.f32 %v166_v10, %v168_v14  ;;  %v171_v27 = vmin.f32 %v166_v10, %v169_v15 }
  0x74   : > { %v174_v20 = vpop.permute.xlu2 %173 }
  0x75   : > { %v178_v30 = vmin.f32 %v174_v20, %v176_v18  ;;  %v179_v32 = vmin.f32 %v174_v20, %v177_v21 }
  0x81   : > { %v195_v4 = vpop.permute.xlu0 %194 }
  0x82   : > { %v197_v5 = vsub.f32 %v144_v0, %v195_v4  ;;  %v150_v11 = vpop.permute.xlu1 %149  ;;  %v248_v0 = vadd.s32 %v246_v55, %v244_v54 }
  0x83   : > { %v154_v28 = vmax.f32 %v150_v11, %v152_v16  ;;  %v155_v29 = vmax.f32 %v150_v11, %v153_v17 }
  0x84   : > { %199 = vrot.lane.b32.xlu0 %v197_v5, %s588_s20 }
  0x85   : > { %v186_v36 = vsub.f32 %v170_v26, %v154_v28  ;;  %v187_v38 = vsub.f32 %v171_v27, %v155_v29  ;;  %vm180_vm0 = vcmp.lt.f32.partialorder %v154_v28, %v170_v26  ;;  %vm181_vm2 = vcmp.lt.f32.partialorder %v155_v29, %v171_v27 }
  0x8b   : > { %v158_v22 = vpop.permute.xlu1 %157 }
  0x8c   : > { %v162_v31 = vmax.f32 %v158_v22, %v160_v19  ;;  %v163_v33 = vmax.f32 %v158_v22, %v161_v23 }
  0x8e   : > { %v188_v37 = vsub.f32 %v178_v30, %v162_v31  ;;  %v189_v39 = vsub.f32 %v179_v32, %v163_v33  ;;  %vm182_vm1 = vcmp.lt.f32.partialorder %v162_v31, %v178_v30  ;;  %vm183_vm3 = vcmp.lt.f32.partialorder %v163_v33, %v179_v32 }
  0x8f   : > { %vm667_vm4 = vmand %vm180_vm0, %vm182_vm1 }
  0x90   : > { %v190_v43 = vmul.f32 %v188_v37, %v186_v36  ;;  %v191_v45 = vmul.f32 %v189_v39, %v187_v38  ;;  %vm185_vm5 = vmand %vm181_vm2, %vm183_vm3 }
  0x92   : > { %v192_v49 = vsel %vm667_vm4, %v190_v43, 0.0  ;;  %v193_v52 = vsel %vm185_vm5, %v191_v45, 0.0 }
  0x93   : > { %v219_v59 = vmul.f32 3.0, %v192_v49  ;;  %v220_v60 = vmul.f32 3.0, %v193_v52 }
  0x94   : > { %v234_v56 = vpop.permute.xlu1 %233 }
  0x95   : > { %vm238_vm6 = vcmp.eq.f32.partialorder %v234_v56, %v236_v53  ;;  %vm239_vm7 = vcmp.eq.f32.partialorder %v234_v56, %v237_v57 }
  0xf6   : > { %v200_v8 = vpop.permute.xlu0 %199 }
  0xf7   : > { %v202_v9 = vmul.f32 %v200_v8, %v197_v5 }
  0xf9   : > { %223 = vperm.xlu0 %518, %v202_v9  }
 0x101   : > { %520 = vset.pattern.permute.xlu0 %v589_v6 }
 0x16b   : > { %v224_v58 = vpop.permute.xlu0 %223 }
 0x16c   : > { %v228_v61 = vadd.f32 %v226_v50, %v224_v58  ;;  %v229_v62 = vadd.f32 %v227_v51, %v224_v58 }
 0x16d   : > { %254 = sbr.rel (%p436_p6) target bundleno = 626 (0x272), region = 32 }
 0x16e   : > { %vm230_vm8 = vcmp.gt.f32.partialorder %v219_v59, %v228_v61  ;;  %vm231_vm9 = vcmp.gt.f32.partialorder %v220_v60, %v229_v62 }
 0x16f   : > { %vm240_vm10 = vmand %vm230_vm8, %vm238_vm6 }
 0x170   : > { %vm241_vm11 = vmand %vm231_vm9, %vm239_vm7  ;;  %v249_v1 = vsel %vm240_vm10, %v247_v63, 768 }
 0x171   : > { %v250_v2 = vsel %vm241_vm11, %v248_v0, 768 }
 0x172   : > { %vm255_vm12 = vcmp.lt.s32.totalorder %v249_v1, %v250_v2 }
 0x173   : > { %v256_v3 = vsel %vm255_vm12, %v249_v1, %v250_v2 }
 0x174   : > { %v258_v4 = vshra.s32 %v256_v3, 16  ;;  %v257_v6 = vand.u32 65535, %v256_v3 }
 0x176   : > { %v260_v5 = vcvt.s32.f32 %v258_v4  ;;  %v259_v7 = vcvt.s32.f32 %v257_v6 }
 0x178   : > { %261 = vmin.xlane.f32.xlu0 %v260_v5 }
 0x1eb   : > { %v262_v8 = vpop.xlane.xlu0 %261 }
 0x1ec   : > { %vm263_vm13 = vcmp.eq.f32.partialorder %v260_v5, %v262_v8  ;;  %v268_v10 = vcvt.f32.s32 %v262_v8 }
 0x1ed   : > { %v264_v9 = vsel %vm263_vm13, %v259_v7, inf }
 0x1ee   : > { %265 = vmin.xlane.f32.xlu0 %v264_v9  ;;  %v269_v14 = vshll.u32 %v268_v10, 16 }
 0x260   : > { %274 = sbr.rel (%p437_p7) target bundleno = 615 (0x267), region = 36 }
 0x261   : > { %v266_v11 = vpop.xlane.xlu0 %265 }
 0x262   : > { %v267_v15 = vcvt.f32.s32 %v266_v11 }
 0x264   : > { %v270_v16 = vadd.s32 %v269_v14, %v267_v15 }
 0x265   : > { %vm275_vm14 = vcmask 7168  }
 0x266   : > { %276 = vst.msk [vmem:[#allocation2] sm:$0xff] %vm275_vm14, %v270_v16 }
 0x267 PF: > { %p438_p8 = scmp.le.s32.totalorder %s566_s9, 0 }
 0x269   : > { %280 = sbr.rel (%p438_p8) target bundleno = 626 (0x272), region = 40 }
 0x26e   : > { %v281_v17 = vld [vmem:[#allocation2] sm:$0xff]  ;;  %vm284_vm15 = vcmask 7168  }
 0x26f   : > { %vm282_vm0 = vcmp.lt.s32.totalorder %v281_v17, %v270_v16 }
 0x270   : > { %v283_v18 = vsel %vm282_vm0, %v281_v17, %v270_v16 }
 0x271   : > { %285 = vst.msk [vmem:[#allocation2] sm:$0xff] %vm284_vm15, %v283_v18 }
 0x272 PF: > { %p439_p9 = scmp.ne.s32.totalorder %s570_s10, 1 }
 0x273   : > { %p459_p10 = scmp.eq.s32.totalorder (!%p439_p9), %s566_s9, 0  ;;  %p460_p11 = scmp.gt.s32.totalorder (!%p439_p9), %s566_s9, 0 }
 0x274   : > { %289 = sbr.rel (%p439_p9) target bundleno = 984 (0x3d8), region = 44  ;;  %p461_p12 = scmp.eq.s32.totalorder (!%p439_p9), %s566_s9, 2 }
 0x279   : > { %v290_v19 = vld [vmem:[#allocation2] sm:$0xff]  ;;  %v591_v20 = vmov 0   ;;  %v592_v22 = vmov 0.0   ;;  %v312_v35 = vsub.f32 1.0, %v651_v12  ;;  %v313_v36 = vsub.f32 1.0, %v653_v13 }
 0x27a   : > { %521 = vset.pattern.permute.xlu0 %v591_v20  ;;  %v322_v43 = vrot.slane %v651_v12, 1  ;;  %v323_v45 = vrot.slane %v653_v13, 1  ;;  %vm334_vm5 = vcmask 1040384  }
 0x27b   : > { %292 = vperm.xlu0 %521, %v290_v19  }
 0x2ed   : > { %v293_v21 = vpop.permute.xlu0 %292 }
 0x2ee   : > { %vm294_vm1 = vcmp.eq.s32.totalorder %v293_v21, %v247_v63  ;;  %vm295_vm2 = vcmp.eq.s32.totalorder %v293_v21, %v248_v0 }
 0x2ef   : > { %v296_v23 = vsel %vm294_vm1, 1.0, %v592_v22  ;;  %v297_v24 = vsel %vm295_vm2, 1.0, %v592_v22 }
 0x2f0   : > { %v298_v25 = vrot.slane %v296_v23, 4  ;;  %v304_v26 = vrot.slane %v297_v24, 4 }
 0x2f2   : > { %v299_v27 = vmax.f32 %v296_v23, %v298_v25  ;;  %v305_v28 = vmax.f32 %v297_v24, %v304_v26 }
 0x2f4   : > { %v300_v29 = vrot.slane %v299_v27, 2  ;;  %v306_v30 = vrot.slane %v305_v28, 2 }
 0x2f6   : > { %v301_v31 = vmax.f32 %v299_v27, %v300_v29  ;;  %v307_v32 = vmax.f32 %v305_v28, %v306_v30 }
 0x2f8   : > { %v302_v33 = vrot.slane %v301_v31, 1  ;;  %v308_v34 = vrot.slane %v307_v32, 1 }
 0x2fa   : > { %v303_v37 = vmax.f32 %v301_v31, %v302_v33  ;;  %v309_v38 = vmax.f32 %v307_v32, %v308_v34 }
 0x2fc   : > { %vm310_vm3 = vcmp.gt.f32.partialorder %v303_v37, 0.0  ;;  %vm311_vm4 = vcmp.gt.f32.partialorder %v309_v38, 0.0 }
 0x2fd   : > { %v314_v39 = vsel %vm310_vm3, %v651_v12, %v312_v35  ;;  %v315_v40 = vsel %vm311_vm4, %v653_v13, %v313_v36 }
 0x2fe   : > { %v316_v41 = vadd.f32 1e-08, %v314_v39  ;;  %v317_v42 = vadd.f32 1e-08, %v315_v40 }
 0x300   : > { %522 = vlog2.f32 %v316_v41 }
 0x301   : > { %524 = vlog2.f32 %v317_v42 }
 0x306   : > { %v523_v44 = vpop.eup %522 }
 0x307   : > { %v525_v46 = vpop.eup %524  ;;  %v319_v47 = vmul.f32 0.6931472, %v523_v44 }
 0x308   : > { %v321_v48 = vmul.f32 0.6931472, %v525_v46 }
 0x309   : > { %v326_v49 = vmul.f32 %v322_v43, %v319_v47 }
 0x30a   : > { %v327_v50 = vmul.f32 %v323_v45, %v321_v48 }
 0x30b   : > { %v330_v51 = vrot.slane %v326_v49, 5 }
 0x30c   : > { %v331_v52 = vrot.slane %v327_v50, 5 }
 0x30d   : > { %v335_v53 = vsel %vm334_vm5, %v330_v51, 0.0 }
 0x30e   : > { %v336_v54 = vsel %vm334_vm5, %v331_v52, 0.0 }
 0x30f   : > { %v337_v55 = vadd.f32 %v336_v54, %v335_v53 }
 0x311   : > { %338 = vadd.xlane.f32.xlu0 %v337_v55 }
 0x384   : > { %v339_v56 = vpop.xlane.xlu0 %338 }
 0x385   : > { %v340_v12 = vrot.slane %v339_v56, 4 }
 0x387   : > { %v341_v57 = vadd.f32 %v340_v12, %v339_v56 }
 0x389   : > { %v342_v58 = vrot.slane %v341_v57, 2 }
 0x38b   : > { %v343_v13 = vadd.f32 %v342_v58, %v341_v57 }
 0x38d   : > { %v344_v59 = vrot.slane %v343_v13, 1 }
 0x38f   : > { %v345_v60 = vadd.f32 %v344_v59, %v343_v13 }
 0x391   : > { %447 = vpush %v345_v60 }
 0x3c2   : > { %s448_s27 = spop %447 }
 0x3c3   : > { %450 = sst [smem:[#allocation3]] (%p459_p10), %s448_s27 }
 0x3c4   : > { %s357_s28 = sld [smem:[#allocation3]] }
 0x3ca   : > { %s358_s29 = sadd.f32 %s448_s27, %s357_s28 }
 0x3cc   : > { %452 = sst [smem:[#allocation3]] (%p460_p11), %s358_s29 }
 0x3cd   : > { %s365_s30 = sld [smem:[#allocation3]] }
 0x3d3   : > { %s366_s3 = ssub.f32 0.0, %s365_s30 }
 0x3d5   : > { %s367_s4 = smul.f32 0.0016666667, %s366_s3 }
 0x3d7   : > { %454 = sst [smem:[#allocation4]] (%p461_p12), %s367_s4 }
 0x3d8 PF: > { %p462_p13 = scmp.eq.s32.totalorder %s429_s14, 5  ;;  %s376_s7 = sshll.u32 %s711_s2, 4  ;;  %s377_s7 = int_to_ptr.hbm [resolvable:$true] %s376_s7 }
 0x3d9   : > { %s593_s8 = smov [#allocation4]  }
 0x3da   : > { %456 = dma.smem_to_hbm (%p462_p13), %s593_s8, 16, %s377_s7, [#allocation5]  }
 0x3db   : > { %561 = dma.done.wait (%p462_p13), [#allocation5], 16  }
 0x3dc   : > { %563 = vsyncadd (%p462_p13), [#allocation5], 4294967280 }
 0x3dd   : > { %385 = sfence }
 0x3de PF: > { %s13_s13 = sadd.s32 1, %s582_s13   ;;  %s714_s9 = smov %s574_s11 }
 0x3df   : > { %p10_p0 = scmp.ge.s32.totalorder %s13_s13, 8   ;;  %s715_s10 = smov %s578_s12 }
 0x3e0   : > { %s716_s11 = smov %s719_s15  ;;  %s717_s12 = smov %s723_s16 }
 0x3e1   :  { %12 = sbr.rel (!%p10_p0) target bundleno = 3 (0x3), region = 86 }
 0x3e6   :  { %391 = vsyncpa [#allocation5], 1 }
 0x3e7   :  { %393 = vsyncpa [#allocation5 + $0x1], 1 }

</bundles_post_ra>
